<compile_context>
chip_gen: v5e
topology: v5e:2x2
jax: 0.10.0
libtpu: 0.0.40
codegen_flags: <defaults>
</compile_context>

<pallas_src>
import functools

import jax
import jax.numpy as jnp
from jax.experimental import pallas as pl
from jax.experimental.pallas import tpu as pltpu

_NEG_MAX = float(-jnp.finfo(jnp.float32).max)   # matches torch.finfo(dtype).max mask


# --------------------------------------------------------------------------
# Pallas kernel
# --------------------------------------------------------------------------

def _gat_kernel(h_ref, adj_ref, w_ref, a_ref, o_ref, *, alpha, concat):
    # h_ref:   (T, N, Fin)   T independent graphs (flattened B*L tiles)
    # adj_ref: (N, N)
    # w_ref:   (Fin, Fout)
    # a_ref:   (Fout, 2)     column 0 = a[:Fout], column 1 = a[Fout:]
    # o_ref:   (T, N, Fout)
    T, N, Fin = h_ref.shape
    Fout = w_ref.shape[1]

    # Wh for all T slabs in one MXU matmul (M = T*N).
    h2d = h_ref[...].reshape(T * N, Fin)
    Wh = jnp.dot(h2d, w_ref[...], preferred_element_type=jnp.float32)    # (T*N, Fout)

    # Attention logits: packed a -> [Wh@a1 | Wh@a2] in one matmul.
    Wh12 = jnp.dot(Wh, a_ref[...], preferred_element_type=jnp.float32)   # (T*N, 2)
    Wh12 = Wh12.reshape(T, N, 2)
    Wh1 = Wh12[:, :, 0:1]                          # (T, N, 1)  column term
    Wh2_row = Wh12[:, :, 1:2].reshape(T, 1, N)     # (T, 1, N)  row term (in-kernel "transpose")

    e = Wh1 + Wh2_row                              # (T, N, N)
    e = jnp.where(e > 0, e, alpha * e)             # LeakyReLU(alpha)

    mask = adj_ref[...] > 0                        # (N, N), broadcast over T
    att = jnp.where(mask[None, :, :], e, _NEG_MAX)
    att = att - jnp.max(att, axis=-1, keepdims=True)
    att = jnp.exp(att)
    att = att * pl.reciprocal(jnp.sum(att, axis=-1, keepdims=True), approx=True)
    # TODO(synk): training-mode attention dropout not implemented (eval-mode / p=0 semantics).

    Wh3 = Wh.reshape(T, N, Fout)
    hp = jnp.einsum("tij,tjf->tif", att, Wh3,
                    preferred_element_type=jnp.float32)                  # (T, N, Fout)
    if concat:
        # Overflow-safe ELU: exp only sees the non-positive branch.
        hp = jnp.where(hp > 0, hp, jnp.exp(jnp.minimum(hp, 0.0)) - 1.0)
    o_ref[...] = hp.astype(o_ref.dtype)


# --------------------------------------------------------------------------
# Wrapper
# --------------------------------------------------------------------------

def _largest_divisor_at_most(n, cap):
    t = max(1, min(cap, n))
    while n % t:
        t -= 1
    return t


def graph_attention_layer(h, adj, W, a, *, alpha=0.1, concat=True, block_rows=8):
    """GraphAttentionLayer.forward.

    h: (B, L, N, Fin), adj: (N, N), W: (Fin, Fout), a: (2*Fout, 1).
    Returns (B, L, N, Fout).
    """
    B, L, N, Fin = h.shape
    Fout = W.shape[1]
    M = B * L
    # Batch several (N, Fin) graph slabs per grid step; keep >=2 grid steps
    # at the demo size so both v7x TensorCores receive work.
    T = _largest_divisor_at_most(M, block_rows)

    hf = h.reshape(M, N, Fin)
    a_pair = jnp.concatenate([a[:Fout], a[Fout:]], axis=1)                # (Fout, 2)

    out = pl.pallas_call(
        functools.partial(_gat_kernel, alpha=alpha, concat=concat),
        grid=(M // T,),
        in_specs=[pl.BlockSpec((T, N, Fin), lambda i: (i, 0, 0)),
                  pl.BlockSpec((N, N), lambda i: (0, 0)),
                  pl.BlockSpec((Fin, Fout), lambda i: (0, 0)),
                  pl.BlockSpec((Fout, 2), lambda i: (0, 0))],
        out_specs=pl.BlockSpec((T, N, Fout), lambda i: (i, 0, 0)),
        out_shape=jax.ShapeDtypeStruct((M, N, Fout), h.dtype),
        compiler_params=pltpu.CompilerParams(dimension_semantics=("parallel",)),
    )(hf, adj, W, a_pair)
    return out.reshape(B, L, N, Fout)


# --------------------------------------------------------------------------
# Pure-JAX reference (mirrors the PyTorch module, eval mode)
# --------------------------------------------------------------------------

def graph_attention_ref(h, adj, W, a, *, alpha=0.1, concat=True):
    Fout = W.shape[1]
    Wh = h @ W
    Wh1 = Wh @ a[:Fout]
    Wh2 = Wh @ a[Fout:]
    e = Wh1 + jnp.swapaxes(Wh2, -1, -2)
    e = jnp.where(e > 0, e, alpha * e)
    att = jnp.where(adj > 0, e, _NEG_MAX)
    att = jax.nn.softmax(att, axis=-1)
    hp = att @ Wh
    return jax.nn.elu(hp) if concat else hp


# --------------------------------------------------------------------------
# Demo / self-check
# --------------------------------------------------------------------------

if __name__ == "__main__":
    B, L, N, Fin, Fout = 2, 8, 8, 32, 32
    alpha = 0.1

    key = jax.random.PRNGKey(0)
    kh, km, ka, kw, kav = jax.random.split(key, 5)

    h = jax.random.normal(kh, (B, L, N, Fin), jnp.float32)
    mask = (jax.random.uniform(km, (N, N)) > 0.5).astype(jnp.float32)
    adj = mask * jax.random.uniform(ka, (N, N)) + jnp.eye(N, dtype=jnp.float32)

    # Xavier-uniform init with gain=1.414, as in the PyTorch module.
    lim_w = 1.414 * (6.0 / (Fin + Fout)) ** 0.5
    W = jax.random.uniform(kw, (Fin, Fout), jnp.float32, -lim_w, lim_w)
    lim_a = 1.414 * (6.0 / (2 * Fout + 1)) ** 0.5
    a = jax.random.uniform(kav, (2 * Fout, 1), jnp.float32, -lim_a, lim_a)

    # concat=True path (hidden GAT head: ELU applied)
    fwd = jax.jit(functools.partial(graph_attention_layer, alpha=alpha, concat=True))
    out = jax.block_until_ready(fwd(h, adj, W, a))
    ref = graph_attention_ref(h, adj, W, a, alpha=alpha, concat=True)
    assert out.shape == (B, L, N, Fout)
    assert bool(jnp.all(jnp.isfinite(out)))
    assert jnp.allclose(out, ref, rtol=2e-2, atol=2e-2), float(jnp.max(jnp.abs(out - ref)))

    # concat=False path (output attention layer: no ELU)
    fwd2 = jax.jit(functools.partial(graph_attention_layer, alpha=alpha, concat=False))
    out2 = jax.block_until_ready(fwd2(h, adj, W, a))
    ref2 = graph_attention_ref(h, adj, W, a, alpha=alpha, concat=False)
    assert jnp.allclose(out2, ref2, rtol=2e-2, atol=2e-2), float(jnp.max(jnp.abs(out2 - ref2)))

    print("KERNEL_OK")
</pallas_src>

<mosaic_0001>
module attributes {stable_mosaic.version = 11 : i64} {
  func.func @_gat_kernel(%arg0: i32, %arg1: memref<8x8x32xf32, #tpu.memory_space<vmem>>, %arg2: memref<8x8xf32, #tpu.memory_space<vmem>>, %arg3: memref<32x32xf32, #tpu.memory_space<vmem>>, %arg4: memref<32x2xf32, #tpu.memory_space<vmem>>, %arg5: memref<8x8x32xf32, #tpu.memory_space<vmem>>) attributes {dimension_semantics = [#tpu.dimension_semantics<parallel>], iteration_bounds = array<i64: 2>, scalar_prefetch = 0 : i64, scratch_operands = 0 : i64, tpu.core_type = #tpu.core_type<tc>, window_params = [{transform_indices = @transform_0, window_bounds = array<i64: 8, 8, 32>}, {pipeline_mode = #tpu.pipeline_mode<synchronous>, transform_indices = @transform_1, window_bounds = array<i64: 8, 8>}, {pipeline_mode = #tpu.pipeline_mode<synchronous>, transform_indices = @transform_2, window_bounds = array<i64: 32, 32>}, {pipeline_mode = #tpu.pipeline_mode<synchronous>, transform_indices = @transform_3, window_bounds = array<i64: 32, 2>}, {transform_indices = @transform_4, window_bounds = array<i64: 8, 8, 32>}]} {
    %c0 = arith.constant 0 : index
    %c0_0 = arith.constant 0 : index
    %c0_1 = arith.constant 0 : index
    %0 = vector.load %arg1[%c0, %c0_0, %c0_1] : memref<8x8x32xf32, #tpu.memory_space<vmem>>, vector<8x8x32xf32>
    %1 = vector.shape_cast %0 : vector<8x8x32xf32> to vector<64x32xf32>
    %c0_2 = arith.constant 0 : index
    %c0_3 = arith.constant 0 : index
    %2 = vector.load %arg3[%c0_2, %c0_3] : memref<32x32xf32, #tpu.memory_space<vmem>>, vector<32x32xf32>
    %cst = arith.constant dense<0.000000e+00> : vector<64x32xf32>
    %3 = tpu.matmul %1, %2, %cst {dimension_numbers = #tpu.dot_dimension_numbers<[1], [0], [0], [1], [0, 0, 1, 1], [], []>} : vector<64x32xf32>, vector<32x32xf32>, vector<64x32xf32> -> vector<64x32xf32>
    %c0_4 = arith.constant 0 : index
    %c0_5 = arith.constant 0 : index
    %4 = vector.load %arg4[%c0_4, %c0_5] : memref<32x2xf32, #tpu.memory_space<vmem>>, vector<32x2xf32>
    %cst_6 = arith.constant dense<0.000000e+00> : vector<64x2xf32>
    %5 = tpu.matmul %3, %4, %cst_6 {dimension_numbers = #tpu.dot_dimension_numbers<[1], [0], [0], [1], [0, 0, 1, 1], [], []>} : vector<64x32xf32>, vector<32x2xf32>, vector<64x2xf32> -> vector<64x2xf32>
    %6 = vector.shape_cast %5 : vector<64x2xf32> to vector<8x8x2xf32>
    %7 = vector.extract_strided_slice %6 {offsets = [0, 0, 0], sizes = [8, 8, 1], strides = [1, 1, 1]} : vector<8x8x2xf32> to vector<8x8x1xf32>
    %8 = vector.extract_strided_slice %6 {offsets = [0, 0, 1], sizes = [8, 8, 1], strides = [1, 1, 1]} : vector<8x8x2xf32> to vector<8x8x1xf32>
    %9 = vector.shape_cast %8 : vector<8x8x1xf32> to vector<8x1x8xf32>
    %10 = vector.broadcast %7 : vector<8x8x1xf32> to vector<8x8x8xf32>
    %11 = vector.broadcast %9 : vector<8x1x8xf32> to vector<8x8x8xf32>
    %12 = arith.addf %10, %11 : vector<8x8x8xf32>
    %cst_7 = arith.constant 0.000000e+00 : f32
    %13 = vector.broadcast %cst_7 : f32 to vector<8x8x8xf32>
    %14 = arith.cmpf ogt, %12, %13 : vector<8x8x8xf32>
    %cst_8 = arith.constant 1.000000e-01 : f32
    %15 = vector.broadcast %cst_8 : f32 to vector<8x8x8xf32>
    %16 = arith.mulf %15, %12 : vector<8x8x8xf32>
    %17 = arith.select %14, %12, %16 : vector<8x8x8xi1>, vector<8x8x8xf32>
    %c0_9 = arith.constant 0 : index
    %c0_10 = arith.constant 0 : index
    %18 = vector.load %arg2[%c0_9, %c0_10] : memref<8x8xf32, #tpu.memory_space<vmem>>, vector<8x8xf32>
    %cst_11 = arith.constant 0.000000e+00 : f32
    %19 = vector.broadcast %cst_11 : f32 to vector<8x8xf32>
    %20 = arith.cmpf ogt, %18, %19 : vector<8x8xf32>
    %21 = vector.shape_cast %20 : vector<8x8xi1> to vector<1x8x8xi1>
    %cst_12 = arith.constant -3.40282347E+38 : f32
    %22 = vector.shape_cast %21 : vector<1x8x8xi1> to vector<1x8x8xi1>
    %23 = vector.broadcast %22 : vector<1x8x8xi1> to vector<8x8x8xi1>
    %24 = vector.broadcast %cst_12 : f32 to vector<8x8x8xf32>
    %25 = arith.select %23, %17, %24 : vector<8x8x8xi1>, vector<8x8x8xf32>
    %cst_13 = arith.constant dense<0xFF800000> : vector<8x8xf32>
    %26 = vector.multi_reduction <maximumf>, %25, %cst_13 [2] : vector<8x8x8xf32> to vector<8x8xf32>
    %27 = vector.shape_cast %26 : vector<8x8xf32> to vector<8x8x1xf32>
    %28 = vector.broadcast %27 : vector<8x8x1xf32> to vector<8x8x8xf32>
    %29 = arith.subf %25, %28 : vector<8x8x8xf32>
    %30 = math.exp %29 : vector<8x8x8xf32>
    %cst_14 = arith.constant dense<0.000000e+00> : vector<8x8xf32>
    %31 = vector.multi_reduction <add>, %30, %cst_14 [2] : vector<8x8x8xf32> to vector<8x8xf32>
    %32 = vector.shape_cast %31 : vector<8x8xf32> to vector<8x8x1xf32>
    %33 = tpu.reciprocal %32 {approx = true} : vector<8x8x1xf32> -> vector<8x8x1xf32>
    %34 = vector.broadcast %33 : vector<8x8x1xf32> to vector<8x8x8xf32>
    %35 = arith.mulf %30, %34 : vector<8x8x8xf32>
    %36 = vector.shape_cast %3 : vector<64x32xf32> to vector<8x8x32xf32>
    "tpu.trace_start"() <{level = 10 : i32, message = "tij,tjf->tif"}> : () -> ()
    %cst_15 = arith.constant dense<0.000000e+00> : vector<8x8x32xf32>
    %37 = tpu.matmul %35, %36, %cst_15 {dimension_numbers = #tpu.dot_dimension_numbers<[2], [1], [1], [2], [0, 0, 0, 1, 1, 2], [0], [0]>} : vector<8x8x8xf32>, vector<8x8x32xf32>, vector<8x8x32xf32> -> vector<8x8x32xf32>
    %cst_16 = arith.constant 0.000000e+00 : f32
    "tpu.trace_stop"() : () -> ()
    %38 = vector.broadcast %cst_16 : f32 to vector<8x8x32xf32>
    %39 = arith.cmpf ogt, %37, %38 : vector<8x8x32xf32>
    %cst_17 = arith.constant 0.000000e+00 : f32
    %40 = vector.broadcast %cst_17 : f32 to vector<8x8x32xf32>
    %41 = arith.minimumf %37, %40 : vector<8x8x32xf32>
    %42 = math.exp %41 : vector<8x8x32xf32>
    %cst_18 = arith.constant 1.000000e+00 : f32
    %43 = vector.broadcast %cst_18 : f32 to vector<8x8x32xf32>
    %44 = arith.subf %42, %43 : vector<8x8x32xf32>
    %45 = arith.select %39, %37, %44 : vector<8x8x32xi1>, vector<8x8x32xf32>
    %c0_19 = arith.constant 0 : index
    %c0_20 = arith.constant 0 : index
    %c0_21 = arith.constant 0 : index
    %46 = vector.load %arg5[%c0_19, %c0_20, %c0_21] : memref<8x8x32xf32, #tpu.memory_space<vmem>>, vector<8x8x32xf32>
    tpu.vector_store %arg5[%c0_19, %c0_20, %c0_21], %45 {strides = array<i32>} : memref<8x8x32xf32, #tpu.memory_space<vmem>>, vector<8x8x32xf32>,
    return
  }
  func.func @transform_0(%arg0: i32) -> (i32, i32, i32) {
    %c0_i32 = arith.constant 0 : i32
    %c0_i32_0 = arith.constant 0 : i32
    %c0_i32_1 = arith.constant 0 : i32
    return %arg0, %c0_i32, %c0_i32_0 : i32, i32, i32
  }
  func.func @transform_1(%arg0: i32) -> (i32, i32) {
    %c0_i32 = arith.constant 0 : i32
    %c0_i32_0 = arith.constant 0 : i32
    %c0_i32_1 = arith.constant 0 : i32
    return %c0_i32, %c0_i32_0 : i32, i32
  }
  func.func @transform_2(%arg0: i32) -> (i32, i32) {
    %c0_i32 = arith.constant 0 : i32
    %c0_i32_0 = arith.constant 0 : i32
    %c0_i32_1 = arith.constant 0 : i32
    return %c0_i32, %c0_i32_0 : i32, i32
  }
  func.func @transform_3(%arg0: i32) -> (i32, i32) {
    %c0_i32 = arith.constant 0 : i32
    %c0_i32_0 = arith.constant 0 : i32
    %c0_i32_1 = arith.constant 0 : i32
    return %c0_i32, %c0_i32_0 : i32, i32
  }
  func.func @transform_4(%arg0: i32) -> (i32, i32, i32) {
    %c0_i32 = arith.constant 0 : i32
    %c0_i32_0 = arith.constant 0 : i32
    %c0_i32_1 = arith.constant 0 : i32
    return %arg0, %c0_i32, %c0_i32_0 : i32, i32, i32
  }
}

</mosaic_0001>

<bundles_post_ra>
// kernel: graph_attention_layer.1
= control target key start
LH: loop header
LB: loop body
LE: loop exit
PB: predicated region body
PF: predicated region fallthrough
CT: control target
= control target key end

     0   :  { %9 = vsyncpa [#allocation3], 0  ;;  %s1539_s0 = inlined_call_operand.hbm [shape: f32[16,8,32], index: 0, kind: input, shape index: {}]   ;;  %s1540_s1 = inlined_call_operand.vmem [shape: f32[8,8], index: 1, kind: input, shape index: {}]   ;;  %s1541_s2 = inlined_call_operand.vmem [shape: f32[32,32], index: 2, kind: input, shape index: {}]   ;;  %s1542_s3 = inlined_call_operand.vmem [shape: f32[32,2], index: 3, kind: input, shape index: {}]   ;;  %s1543_s4 = inlined_call_operand.hbm [shape: f32[16,8,32], index: 4, kind: output, shape index: {}]  }
   0x1   :  { %11 = vsyncpa [#allocation3 + $0x1], 0 }
   0x2   :  { %12 = vsyncpa [#allocation4], 0 }
   0x3   :  { %14 = vsyncpa [#allocation4 + $0x1], 0  ;;  %s1259_s15 = smov 0   ;;  %s1261_s16 = smov 0  }
   0x4   :  { %s1263_s17 = smov 0   ;;  %s1265_s18 = smov 0  }
   0x5 LB: > { %s1280_s19 = sadd.s32 4294967295, %s1226_s18   ;;  %s965_s20 = sadd.s32 4294967294, %s1226_s18   ;;  %s1226_s18 = sphi %s1265_s18, %s1553_s18   ;;  %s1222_s17 = sphi %s1263_s17, %s1552_s17   ;;  %s1218_s16 = sphi %s1261_s16, %s1551_s16   ;;  %s1214_s15 = sphi %s1259_s15, %s1550_s15  }
   0x6   : > { %s1284_s21 = sadd.s32 1, %s1226_s18   ;;  %s27_s22 = sadd.s32 1, %s1222_s17 }
   0x7   : > { %s24_s23 = ssub.s32 %s1226_s18, %s1284_s21  ;;  %p34_p0 = scmp.ne.s32.totalorder %s1222_s17, %s1218_s16 }
   0x8   : > { %p25_p1 = scmp.eq.s32.totalorder %s24_s23, 0  ;;  %p35_p2 = scmp.eq.s32.totalorder %s1226_s18, 0 }
   0x9   : > { %p40_p3 = scmp.ne.s32.totalorder %s1218_s16, %s1214_s15  ;;  %p41_p4 = scmp.eq.s32.totalorder %s1280_s19, 0 }
   0xa   : > { %s1296_s24 = scalar_select %p25_p1, %s1222_s17, %s27_s22  }
   0xb   : > { %p1298_p5 = por %p35_p2, %p34_p0  ;;  %p1302_p6 = por %p41_p4, %p40_p3 }
   0xc   : > { %p127_p7 = scmp.eq.s32.totalorder %s1280_s19, 1  ;;  %p133_p8 = scmp.eq.s32.totalorder %s965_s20, 1 }
   0xd   : > { %p1033_p10 = scmp.lt.s32.totalorder %s1226_s18, 2  ;;  %s162_s29 = sand.u32 1, %s1222_s17  }
   0xe   : > { %p1309_p11 = por %p127_p7, %p34_p0  ;;  %p1313_p12 = por %p133_p8, %p40_p3 }
   0xf   : > { %s1011_s30 = sshll.u32 %s1226_s18, 6  ;;  %s968_s5 = sshll.u32 %s162_s29, 6 }
  0x10   : > { %s171_s8 = scalar_lea.hbm %s1539_s0, %s1011_s30  ;;  %s166_s10 = scalar_lea.vmem [#allocation2], %s968_s5 }
  0x11   : > { %s172_s9 = sshll.u32 %s171_s8, 4  ;;  %s174_s11 = sshll.u32 %s166_s10, 4  ;;  %s173_s9 = int_to_ptr.hbm [resolvable:$true] %s172_s9  ;;  %s175_s11 = int_to_ptr.vmem [resolvable:$true] %s174_s11 }
  0x12   : > { %p1324_p13 = pnand %p1033_p10, %p1298_p5  ;;  %p971_p0 = scmp.ge.s32.totalorder %s1226_s18, 1 }
  0x13   : > { %p182_p1 = scmp.lt.s32.totalorder %s1226_s18, 3  ;;  %s163_s13 = scalar_lea.sflag [#allocation3], %s162_s29 }
  0x14   : > { %s1130_s14 = sshra.s32 %s173_s9, 4  ;;  %p1134_p3 = pneg %p1324_p13  ;;  %s1131_s14 = int_to_ptr.hbm [resolvable:$true] %s1130_s14 }
  0x15   : > { %s1132_s20 = scalar_lea.hbm %s1131_s14, 64  ;;  %s1137_s25 = scalar_lea.hbm %s1539_s0, 128 }
  0x16   : > { %p1133_p2 = scmp.ne.s32.totalorder %s1131_s14, %s1132_s20  ;;  %p1138_p5 = scmp.lt.s32.totalorder %s1131_s14, %s1539_s0 }
  0x17   : > { %p1139_p8 = scmp.lt.s32.totalorder %s1137_s25, %s1132_s20 }
  0x18   : > { %p1135_p4 = pnand %p1134_p3, %p1133_p2 }
  0x19   : > { %p1140_p10 = por %p1139_p8, %p1138_p5 }
  0x1a   : > { %p1136_p7 = pneg %p1135_p4 }
  0x1c   : > { %p1141_p9 = pnand %p1140_p10, %p1136_p7 }
  0x1e   : > { %1144 = shalt.err (!%p1141_p9)
}
  0x1f   : > { %s1228_s29 = smov 128   ;;  %s1229_s6 = smov 8  }
  0x20   : > { %1028 = dma.hbm_to_vmem [thread:$0]  (!%p1324_p13), %s173_s9, 1024, %s175_s11, %s163_s13, %s1228_s29, %s1228_s29, %s1229_s6  }
  0x21   : > { %p183_p2 = pnand %p971_p0, %p182_p1 }
  0x22   : > { %s1345_s7 = sand.u32 (!%p183_p2), 1, %s1218_s16  }
  0x23   : > { %186 = sbr.rel (%p183_p2) target bundleno = 884 (0x374), region = 36  ;;  %s972_s8 = sshll.u32 (!%p183_p2), %s1345_s7, 6 }
  0x24   : > { %s189_s10 = scalar_lea.sflag (!%p183_p2), [#allocation3], %s1345_s7  ;;  %s1351_s14 = scalar_lea.vmem (!%p183_p2), [#allocation2], %s972_s8 }
  0x28   : > { %1205 = dma.done.wait (%p1302_p6), %s189_s10, 1024  }
  0x29   : > { %1207 = vsyncadd (%p1302_p6), %s189_s10, 4294966272  ;;  %v231_v0 = vld [vmem:[%s1541_s2 + $0x18] sm:$0xff]  ;;  %v230_v1 = vld [vmem:[%s1541_s2 + $0x10] sm:$0xff]  ;;  %vm232_vm0 = vcmask 261120   ;;  %v1230_v19 = vmov 1   ;;  %v1231_v20 = vmov 0   ;;  %v431_v35 = vlaneseq }
  0x2a   : > { %269 = vmatpush.msra.mxu0 %v231_v0  ;;  %1013 = vmatpush.msra.mxu2 %v231_v0  ;;  %v229_v2 = vld [vmem:[%s1541_s2 + $0x8] sm:$0xff]  ;;  %v228_v3 = vld [vmem:[%s1541_s2] sm:$0xff]  ;;  %v226_v5 = vld [vmem:[%s1351_s14 + $0x30] sm:$0xff]  ;;  %vm547_vm3 = vcmask 64512   ;;  %s1487_s13 = scalar_lea.vmem [#allocation5], %s972_s8  ;;  %s1012_s8 = sshll.u32 %s1280_s19, 6 }
  0x2b   : > { %v220_v4 = vld [vmem:[%s1351_s14] sm:$0xff]  ;;  %v221_v6 = vld [vmem:[%s1351_s14 + $0x8] sm:$0xff]  ;;  %v227_v7 = vld [vmem:[%s1351_s14 + $0x38] sm:$0xff]  ;;  %1073 = vset.pattern.permute.xlu0 %v1230_v19  ;;  %1074 = vset.pattern.permute.xlu1 %v1231_v20  ;;  %v1417_v36 = vand.u32 127, %v431_v35  ;;  %s888_s26 = scalar_lea.hbm %s1543_s4, %s1012_s8  ;;  %s889_s23 = sshll.u32 %s1487_s13, 4  ;;  %s890_s23 = int_to_ptr.vmem [resolvable:$true] %s889_s23 }
  0x2c   : > { %270 = vmatpush.msra.mxu0 %v230_v1  ;;  %1014 = vmatpush.msra.mxu2 %v230_v1  ;;  %v301_v8 = vld [vmem:[%s1542_s3 + $0x18] sm:$0xff]  ;;  %v300_v9 = vld [vmem:[%s1542_s3 + $0x10] sm:$0xff]  ;;  %v299_v10 = vld [vmem:[%s1542_s3 + $0x8] sm:$0xff]  ;;  %s891_s25 = sshll.u32 %s888_s26, 4  ;;  %s877_s19 = scalar_lea.sflag [#allocation4], %s1345_s7  ;;  %s892_s25 = int_to_ptr.hbm [resolvable:$true] %s891_s25 }
  0x2d   : > { %338 = vmatpush.msra.mxu1 %v301_v8  ;;  %1017 = vmatpush.msra.mxu3 %v301_v8  ;;  %v222_v11 = vld [vmem:[%s1351_s14 + $0x10] sm:$0xff]  ;;  %v223_v12 = vld [vmem:[%s1351_s14 + $0x18] sm:$0xff]  ;;  %v224_v13 = vld [vmem:[%s1351_s14 + $0x20] sm:$0xff]  ;;  %s1174_s30 = sshra.s32 %s892_s25, 4  ;;  %s1180_s10 = scalar_lea.hbm %s1543_s4, 128  ;;  %s1175_s30 = int_to_ptr.hbm [resolvable:$true] %s1174_s30 }
  0x2e   : > { %271 = vmatpush.msra.mxu0 %v229_v2  ;;  %1015 = vmatpush.msra.mxu2 %v229_v2  ;;  %v225_v14 = vld [vmem:[%s1351_s14 + $0x28] sm:$0xff]  ;;  %v298_v15 = vld [vmem:[%s1542_s3] sm:$0xff]  ;;  %s1176_s5 = scalar_lea.hbm %s1175_s30, 64  ;;  %p1181_p0 = scmp.lt.s32.totalorder %s1175_s30, %s1543_s4 }
  0x2f   : > { %339 = vmatpush.msra.mxu1 %v300_v9  ;;  %1018 = vmatpush.msra.mxu3 %v300_v9  ;;  %v1423_v41 = vld [vmem:[%s1540_s1] sm:$0xff]  ;;  %p1177_p6 = scmp.ne.s32.totalorder %s1175_s30, %s1176_s5  ;;  %p1182_p1 = scmp.lt.s32.totalorder %s1180_s10, %s1176_s5 }
  0x30   : > { %272 = vmatpush.msra.mxu0 %v228_v3  ;;  %1016 = vmatpush.msra.mxu2 %v228_v3  ;;  %vm536_vm2 = vcmp.gt.f32.partialorder %v1423_v41, 0.0 }
  0x31   : > { %974 = vmatmul.msk.f32.vlgmr.msra.gmra.mxu0 %vm232_vm0, %v220_v4  ;;  %980 = vmatmul.msk.f32.vlgmr.msra.gmra.mxu2 %vm232_vm0, %v226_v5  ;;  %p1178_p9 = pnand %p1177_p6, %p1309_p11  ;;  %p1183_p3 = por %p1182_p1, %p1181_p0 }
  0x32   : > { %340 = vmatpush.msra.mxu1 %v299_v10  ;;  %1019 = vmatpush.msra.mxu3 %v299_v10 }
  0x33   : > { %1075 = vset.pattern.permute.xlu2 %v1230_v19  ;;  %p1179_p13 = pneg %p1178_p9 }
  0x34   : > { %341 = vmatpush.msra.mxu1 %v298_v15  ;;  %1020 = vmatpush.msra.mxu3 %v298_v15 }
  0x35   : > { %p1184_p4 = pnand %p1183_p3, %p1179_p13 }
  0x39   : > { %975 = vmatmul.msk.f32.gmra.mxu0 %vm232_vm0, %v221_v6  ;;  %981 = vmatmul.msk.f32.gmra.mxu2 %vm232_vm0, %v227_v7 }
  0x41   : > { %976 = vmatmul.msk.f32.gmra.mxu0 %vm232_vm0, %v222_v11 }
  0x49   : > { %977 = vmatmul.msk.f32.gmra.mxu0 %vm232_vm0, %v223_v12 }
  0x51   : > { %978 = vmatmul.msk.f32.gmra.mxu0 %vm232_vm0, %v224_v13 }
  0x59   : > { %979 = vmatmul.msk.f32.gmra.mxu0 %vm232_vm0, %v225_v14 }
  0xae   : > { %v274_v16 = vpop.f32.mrf.mxu0 }
  0xaf   : > { %982 = vmatmul.msk.f32.vlgmr.msra.gmra.mxu1 %vm232_vm0, %v274_v16  ;;  %654 = vmatpush.msrb.mxu2 %v274_v16 }
  0xb4   : > { %v1398_v17 = vpop.f32.mrf.mxu2 }
  0xb5   : > { %988 = vmatmul.msk.f32.vlgmr.msra.gmra.mxu3 %vm232_vm0, %v1398_v17 }
  0xb6   : > { %v277_v18 = vpop.f32.mrf.mxu0 }
  0xb7   : > { %983 = vmatmul.msk.f32.gmra.mxu1 %vm232_vm0, %v277_v18  ;;  %677 = vmatpush.msrb.mxu3 %v277_v18 }
  0xbc   : > { %v1403_v21 = vpop.f32.mrf.mxu2 }
  0xbd   : > { %989 = vmatmul.msk.f32.gmra.mxu3 %vm232_vm0, %v1403_v21 }
  0xbe   : > { %v280_v22 = vpop.f32.mrf.mxu0 }
  0xbf   : > { %984 = vmatmul.msk.f32.gmra.mxu1 %vm232_vm0, %v280_v22  ;;  %700 = vmatpush.msra.mxu2 %v280_v22 }
  0xc6   : > { %v283_v23 = vpop.f32.mrf.mxu0 }
  0xc7   : > { %985 = vmatmul.msk.f32.gmra.mxu1 %vm232_vm0, %v283_v23  ;;  %723 = vmatpush.msra.mxu3 %v283_v23 }
  0xce   : > { %v1409_v24 = vpop.f32.mrf.mxu0 }
  0xcf   : > { %986 = vmatmul.msk.f32.gmra.mxu1 %vm232_vm0, %v1409_v24 }
  0xd6   : > { %v1413_v25 = vpop.f32.mrf.mxu0 }
  0xd7   : > { %987 = vmatmul.msk.f32.gmra.mxu1 %vm232_vm0, %v1413_v25 }
 0x12c   : > { %v343_v26 = vpop.f32.mrf.mxu1 }
 0x12d   : > { %369 = vperm.xlu1 %1074, %v343_v26   ;;  %408 = vperm.xlu0 %1073, %v343_v26  }
 0x134   : > { %v346_v27 = vpop.f32.mrf.mxu1 }
 0x135   : > { %374 = vperm.xlu1 %1074, %v346_v27   ;;  %411 = vperm.xlu0 %1073, %v346_v27  }
 0x138   : > { %v361_v29 = vpop.f32.mrf.mxu3 }
 0x13c   : > { %v349_v28 = vpop.f32.mrf.mxu1 }
 0x13d   : > { %1076 = vset.pattern.permute.xlu0 %v1231_v20  ;;  %414 = vperm.xlu2 %1075, %v349_v28  }
 0x13e   : > { %379 = vperm.xlu0 %1076, %v349_v28  }
 0x140   : > { %v364_v33 = vpop.f32.mrf.mxu3 }
 0x144   : > { %v352_v30 = vpop.f32.mrf.mxu1 }
 0x145   : > { %384 = vperm.xlu1 %1074, %v352_v30   ;;  %417 = vperm.xlu2 %1075, %v352_v30  }
 0x146   : > { %399 = vperm.xlu0 %1076, %v361_v29  }
 0x14c   : > { %v355_v31 = vpop.f32.mrf.mxu1 }
 0x14d   : > { %420 = vperm.xlu2 %1075, %v355_v31   ;;  %1078 = vset.pattern.permute.xlu1 %v1230_v19 }
 0x154   : > { %v358_v32 = vpop.f32.mrf.mxu1 }
 0x155   : > { %1077 = vset.pattern.permute.xlu2 %v1231_v20  ;;  %394 = vperm.xlu0 %1076, %v358_v32  }
 0x156   : > { %423 = vperm.xlu1 %1078, %v358_v32   ;;  %389 = vperm.xlu2 %1077, %v355_v31  }
 0x15d   : > { %1081 = vset.pattern.permute.xlu0 %v1230_v19 }
 0x15e   : > { %426 = vperm.xlu1 %1078, %v361_v29   ;;  %1079 = vset.pattern.permute.xlu2 %v1230_v19 }
 0x15f   : > { %429 = vperm.xlu2 %1079, %v364_v33  }
 0x166   : > { %1080 = vset.pattern.permute.xlu1 %v1231_v20 }
 0x167   : > { %404 = vperm.xlu1 %1080, %v364_v33  }
 0x197   : > { %v415_v34 = vpop.permute.xlu2 %414 }
 0x198   : > { %v435_v54 = vperm.slane %v415_v34, %v1417_v36 }
 0x19f   : > { %v370_v37 = vpop.permute.xlu1 %369  ;;  %v409_v38 = vpop.permute.xlu0 %408 }
 0x1a0   : > { %v433_v39 = vperm.slane %v409_v38, %v1417_v36  ;;  %v418_v40 = vpop.permute.xlu2 %417 }
 0x1a1   : > { %v436_v62 = vperm.slane %v418_v40, %v1417_v36 }
 0x1a2   : > { %v503_v42 = vadd.f32 %v433_v39, %v370_v37 }
 0x1a4   : > { %vm511_vm1 = vcmp.gt.f32.partialorder %v503_v42, 0.0  ;;  %v519_v43 = vmul.f32 0.1, %v503_v42 }
 0x1a6   : > { %v527_v44 = vsel %vm511_vm1, %v503_v42, %v519_v43 }
 0x1a7   : > { %v412_v45 = vpop.permute.xlu0 %411  ;;  %v1428_v46 = vsel %vm536_vm2, %v527_v44, -3.4028235e+38  ;;  %v375_v49 = vpop.permute.xlu1 %374 }
 0x1a8   : > { %v434_v47 = vperm.slane %v412_v45, %v1417_v36  ;;  %v548_v48 = vsel %vm547_vm3, %v1428_v46, -inf  ;;  %v421_v51 = vpop.permute.xlu2 %420 }
 0x1a9   : > { %549 = vmax.xlane.f32.xlu2 %v548_v48  ;;  %v437_v63 = vperm.slane %v421_v51, %v1417_v36 }
 0x1aa   : > { %v504_v50 = vadd.f32 %v434_v47, %v375_v49 }
 0x1ac   : > { %vm512_vm4 = vcmp.gt.f32.partialorder %v504_v50, 0.0  ;;  %v520_v52 = vmul.f32 0.1, %v504_v50 }
 0x1ae   : > { %v528_v53 = vsel %vm512_vm4, %v504_v50, %v520_v52 }
 0x1af   : > { %v1436_v55 = vsel %vm536_vm2, %v528_v53, -3.4028235e+38 }
 0x1b0   : > { %v380_v56 = vpop.permute.xlu0 %379  ;;  %v551_v57 = vsel %vm547_vm3, %v1436_v55, -inf  ;;  %v390_v60 = vpop.permute.xlu2 %389 }
 0x1b1   : > { %v505_v58 = vadd.f32 %v435_v54, %v380_v56  ;;  %552 = vmax.xlane.f32.xlu0 %v551_v57  ;;  %v507_v3 = vadd.f32 %v437_v63, %v390_v60 }
 0x1b3   : > { %v521_v59 = vmul.f32 0.1, %v505_v58  ;;  %vm513_vm5 = vcmp.gt.f32.partialorder %v505_v58, 0.0  ;;  %v523_v6 = vmul.f32 0.1, %v507_v3  ;;  %vm515_vm7 = vcmp.gt.f32.partialorder %v507_v3, 0.0 }
 0x1b5   : > { %v529_v61 = vsel %vm513_vm5, %v505_v58, %v521_v59  ;;  %v531_v11 = vsel %vm515_vm7, %v507_v3, %v523_v6 }
 0x1b6   : > { %v541_v0 = vsel %vm536_vm2, %v529_v61, -3.4028235e+38  ;;  %v543_v12 = vsel %vm536_vm2, %v531_v11, -3.4028235e+38 }
 0x1b7   : > { %v385_v1 = vpop.permute.xlu1 %384  ;;  %v554_v2 = vsel %vm547_vm3, %v541_v0, -inf  ;;  %v560_v13 = vsel %vm547_vm3, %v543_v12, -inf }
 0x1b8   : > { %v506_v4 = vadd.f32 %v436_v62, %v385_v1  ;;  %555 = vmax.xlane.f32.xlu1 %v554_v2  ;;  %v400_v10 = vpop.permute.xlu0 %399 }
 0x1b9   : > { %v430_v29 = vpop.permute.xlu2 %429 }
 0x1ba   : > { %v522_v5 = vmul.f32 0.1, %v506_v4  ;;  %vm514_vm6 = vcmp.gt.f32.partialorder %v506_v4, 0.0  ;;  %v440_v32 = vperm.slane %v430_v29, %v1417_v36 }
 0x1bc   : > { %v530_v7 = vsel %vm514_vm6, %v506_v4, %v522_v5 }
 0x1bd   : > { %v542_v8 = vsel %vm536_vm2, %v530_v7, -3.4028235e+38 }
 0x1be   : > { %v557_v9 = vsel %vm547_vm3, %v542_v8, -inf }
 0x1bf   : > { %558 = vmax.xlane.f32.xlu2 %v557_v9 }
 0x1c7   : > { %561 = vmax.xlane.f32.xlu2 %v560_v13  ;;  %v395_v16 = vpop.permute.xlu0 %394 }
 0x1c8   : > { %v424_v14 = vpop.permute.xlu1 %423 }
 0x1c9   : > { %v438_v15 = vperm.slane %v424_v14, %v1417_v36 }
 0x1cb   : > { %v508_v18 = vadd.f32 %v438_v15, %v395_v16 }
 0x1cd   : > { %vm516_vm8 = vcmp.gt.f32.partialorder %v508_v18, 0.0  ;;  %v524_v19 = vmul.f32 0.1, %v508_v18 }
 0x1cf   : > { %v532_v20 = vsel %vm516_vm8, %v508_v18, %v524_v19 }
 0x1d0   : > { %v427_v22 = vpop.permute.xlu1 %426  ;;  %v544_v23 = vsel %vm536_vm2, %v532_v20, -3.4028235e+38 }
 0x1d1   : > { %v439_v26 = vperm.slane %v427_v22, %v1417_v36  ;;  %v563_v27 = vsel %vm547_vm3, %v544_v23, -inf }
 0x1d2   : > { %564 = vmax.xlane.f32.xlu0 %v563_v27 }
 0x1d3   : > { %v509_v28 = vadd.f32 %v439_v26, %v400_v10 }
 0x1d5   : > { %vm517_vm9 = vcmp.gt.f32.partialorder %v509_v28, 0.0  ;;  %v525_v30 = vmul.f32 0.1, %v509_v28 }
 0x1d7   : > { %v533_v31 = vsel %vm517_vm9, %v509_v28, %v525_v30 }
 0x1d8   : > { %v545_v33 = vsel %vm536_vm2, %v533_v31, -3.4028235e+38 }
 0x1d9   : > { %v405_v34 = vpop.permute.xlu1 %404  ;;  %v566_v35 = vsel %vm547_vm3, %v545_v33, -inf }
 0x1da   : > { %v510_v37 = vadd.f32 %v440_v32, %v405_v34  ;;  %567 = vmax.xlane.f32.xlu1 %v566_v35 }
 0x1dc   : > { %v526_v38 = vmul.f32 0.1, %v510_v37  ;;  %vm518_vm10 = vcmp.gt.f32.partialorder %v510_v37, 0.0 }
 0x1de   : > { %v534_v39 = vsel %vm518_vm10, %v510_v37, %v526_v38 }
 0x1df   : > { %v546_v40 = vsel %vm536_vm2, %v534_v39, -3.4028235e+38 }
 0x1e0   : > { %v569_v42 = vsel %vm547_vm3, %v546_v40, -inf }
 0x1e1   : > { %570 = vmax.xlane.f32.xlu2 %v569_v42 }
 0x21c   : > { %v550_v43 = vpop.xlane.xlu2 %549 }
 0x21d   : > { %v572_v36 = vsub.f32 %v1428_v46, %v550_v43 }
 0x21f   : > { %v580_v44 = vmul.f32 1.442695, %v572_v36 }
 0x221   : > { %1082 = vpow2.f32 %v580_v44 }
 0x224   : > { %v553_v45 = vpop.xlane.xlu0 %552 }
 0x225   : > { %v573_v47 = vsub.f32 %v1436_v55, %v553_v45 }
 0x227   : > { %v1083_v48 = vpop.eup %1082  ;;  %v582_v49 = vmul.f32 1.442695, %v573_v47 }
 0x228   : > { %v596_v50 = vsel %vm547_vm3, %v1083_v48, 0.0 }
 0x229   : > { %1084 = vpow2.f32 %v582_v49  ;;  %597 = vadd.xlane.f32.xlu0 %v596_v50 }
 0x22b   : > { %v556_v51 = vpop.xlane.xlu1 %555 }
 0x22c   : > { %v574_v41 = vsub.f32 %v541_v0, %v556_v51 }
 0x22e   : > { %v584_v52 = vmul.f32 1.442695, %v574_v41 }
 0x22f   : > { %v1085_v53 = vpop.eup %1084 }
 0x230   : > { %1086 = vpow2.f32 %v584_v52  ;;  %v599_v54 = vsel %vm547_vm3, %v1085_v53, 0.0 }
 0x231   : > { %600 = vadd.xlane.f32.xlu1 %v599_v54 }
 0x232   : > { %v559_v46 = vpop.xlane.xlu2 %558 }
 0x233   : > { %v575_v56 = vsub.f32 %v542_v8, %v559_v46 }
 0x235   : > { %v586_v57 = vmul.f32 1.442695, %v575_v56 }
 0x236   : > { %v1087_v58 = vpop.eup %1086 }
 0x237   : > { %1088 = vpow2.f32 %v586_v57  ;;  %v602_v55 = vsel %vm547_vm3, %v1087_v58, 0.0 }
 0x238   : > { %603 = vadd.xlane.f32.xlu2 %v602_v55 }
 0x23a   : > { %v562_v59 = vpop.xlane.xlu2 %561 }
 0x23b   : > { %v576_v60 = vsub.f32 %v543_v12, %v562_v59 }
 0x23d   : > { %v1089_v61 = vpop.eup %1088  ;;  %v588_v62 = vmul.f32 1.442695, %v576_v60 }
 0x23e   : > { %v605_v63 = vsel %vm547_vm3, %v1089_v61, 0.0 }
 0x23f   : > { %1090 = vpow2.f32 %v588_v62  ;;  %606 = vadd.xlane.f32.xlu0 %v605_v63 }
 0x245   : > { %v1091_v0 = vpop.eup %1090  ;;  %v565_v1 = vpop.xlane.xlu0 %564 }
 0x246   : > { %v577_v2 = vsub.f32 %v544_v23, %v565_v1  ;;  %v608_v3 = vsel %vm547_vm3, %v1091_v0, 0.0 }
 0x247   : > { %609 = vadd.xlane.f32.xlu1 %v608_v3 }
 0x248   : > { %v590_v4 = vmul.f32 1.442695, %v577_v2 }
 0x24a   : > { %1092 = vpow2.f32 %v590_v4 }
 0x24d   : > { %v568_v5 = vpop.xlane.xlu1 %567 }
 0x24e   : > { %v578_v6 = vsub.f32 %v545_v33, %v568_v5 }
 0x250   : > { %v1093_v7 = vpop.eup %1092  ;;  %v592_v8 = vmul.f32 1.442695, %v578_v6 }
 0x251   : > { %v611_v9 = vsel %vm547_vm3, %v1093_v7, 0.0 }
 0x252   : > { %1094 = vpow2.f32 %v592_v8  ;;  %612 = vadd.xlane.f32.xlu2 %v611_v9 }
 0x254   : > { %v571_v10 = vpop.xlane.xlu2 %570 }
 0x255   : > { %v579_v11 = vsub.f32 %v546_v40, %v571_v10 }
 0x257   : > { %v594_v12 = vmul.f32 1.442695, %v579_v11 }
 0x258   : > { %v1095_v13 = vpop.eup %1094 }
 0x259   : > { %1096 = vpow2.f32 %v594_v12  ;;  %v614_v14 = vsel %vm547_vm3, %v1095_v13, 0.0 }
 0x25a   : > { %615 = vadd.xlane.f32.xlu0 %v614_v14 }
 0x25f   : > { %v1097_v15 = vpop.eup %1096 }
 0x260   : > { %v617_v16 = vsel %vm547_vm3, %v1097_v15, 0.0 }
 0x261   : > { %618 = vadd.xlane.f32.xlu1 %v617_v16 }
 0x29c   : > { %v598_v18 = vpop.xlane.xlu0 %597 }
 0x29d   : > { %1098 = vrcp.f32 %v598_v18 }
 0x2a3   : > { %v1099_v19 = vpop.eup %1098 }
 0x2a4   : > { %v601_v20 = vpop.xlane.xlu1 %600  ;;  %v628_v22 = vmul.f32 %v1099_v19, %v1083_v48 }
 0x2a5   : > { %1100 = vrcp.f32 %v601_v20 }
 0x2a6   : > { %990 = vmatmul.msk.f32.vlgmr.msrb.gmra.mxu2 %vm547_vm3, %v628_v22 }
 0x2a7   : > { %746 = vmatpush.msrb.mxu2 %v1409_v24 }
 0x2ab   : > { %v1101_v23 = vpop.eup %1100  ;;  %v604_v26 = vpop.xlane.xlu2 %603 }
 0x2ac   : > { %1102 = vrcp.f32 %v604_v26  ;;  %v629_v27 = vmul.f32 %v1101_v23, %v1085_v53 }
 0x2ae   : > { %991 = vmatmul.msk.f32.vlgmr.msrb.gmra.mxu3 %vm547_vm3, %v629_v27 }
 0x2af   : > { %769 = vmatpush.msrb.mxu3 %v1413_v25 }
 0x2b2   : > { %v1103_v28 = vpop.eup %1102  ;;  %v607_v29 = vpop.xlane.xlu0 %606 }
 0x2b3   : > { %v630_v30 = vmul.f32 %v1103_v28, %v1087_v58  ;;  %1104 = vrcp.f32 %v607_v29 }
 0x2b5   : > { %992 = vmatmul.msk.f32.vlgmr.msra.gmra.mxu2 %vm547_vm3, %v630_v30 }
 0x2b6   : > { %792 = vmatpush.msra.mxu2 %v1398_v17 }
 0x2b9   : > { %v1105_v31 = vpop.eup %1104 }
 0x2ba   : > { %v631_v32 = vmul.f32 %v1105_v31, %v1089_v61  ;;  %v610_v33 = vpop.xlane.xlu1 %609 }
 0x2bb   : > { %1106 = vrcp.f32 %v610_v33 }
 0x2bc   : > { %993 = vmatmul.msk.f32.vlgmr.msra.gmra.mxu3 %vm547_vm3, %v631_v32 }
 0x2bd   : > { %815 = vmatpush.msra.mxu3 %v1403_v21 }
 0x2c1   : > { %v1107_v24 = vpop.eup %1106 }
 0x2c2   : > { %v632_v34 = vmul.f32 %v1107_v24, %v1091_v0 }
 0x2c4   : > { %994 = vmatmul.msk.f32.vlgmr.msrb.gmra.mxu2 %vm547_vm3, %v632_v34 }
 0x2c5   : > { %v613_v25 = vpop.xlane.xlu2 %612 }
 0x2c6   : > { %1108 = vrcp.f32 %v613_v25 }
 0x2cc   : > { %v1109_v35 = vpop.eup %1108 }
 0x2cd   : > { %v633_v37 = vmul.f32 %v1109_v35, %v1093_v7  ;;  %v616_v38 = vpop.xlane.xlu0 %615 }
 0x2ce   : > { %1110 = vrcp.f32 %v616_v38 }
 0x2cf   : > { %995 = vmatmul.msk.f32.vlgmr.msrb.gmra.mxu3 %vm547_vm3, %v633_v37 }
 0x2d4   : > { %v1111_v17 = vpop.eup %1110  ;;  %v619_v39 = vpop.xlane.xlu1 %618 }
 0x2d5   : > { %v634_v40 = vmul.f32 %v1111_v17, %v1095_v13  ;;  %1112 = vrcp.f32 %v619_v39 }
 0x2d7   : > { %996 = vmatmul.msk.f32.vlgmr.msra.gmra.mxu2 %vm547_vm3, %v634_v40 }
 0x2db   : > { %v1113_v21 = vpop.eup %1112 }
 0x2dc   : > { %v635_v42 = vmul.f32 %v1113_v21, %v1097_v15 }
 0x2de   : > { %997 = vmatmul.msk.f32.vlgmr.msra.gmra.mxu3 %vm547_vm3, %v635_v42 }
 0x329   : > { %v656_v43 = vpop.f32.mrf.mxu2 }
 0x32a   : > { %v828_v36 = vmin.f32 %v656_v43, 0.0  ;;  %vm820_vm11 = vcmp.gt.f32.partialorder %v656_v43, 0.0 }
 0x32c   : > { %v836_v44 = vmul.f32 1.442695, %v828_v36 }
 0x32e   : > { %1114 = vpow2.f32 %v836_v44 }
 0x331   : > { %v679_v45 = vpop.f32.mrf.mxu3 }
 0x332   : > { %v829_v47 = vmin.f32 %v679_v45, 0.0  ;;  %vm821_vm12 = vcmp.gt.f32.partialorder %v679_v45, 0.0 }
 0x334   : > { %v1115_v48 = vpop.eup %1114  ;;  %v838_v49 = vmul.f32 1.442695, %v829_v47 }
 0x335   : > { %v998_v50 = vadd.f32 -1.0, %v1115_v48 }
 0x336   : > { %1116 = vpow2.f32 %v838_v49 }
 0x337   : > { %v860_v51 = vsel %vm820_vm11, %v656_v43, %v998_v50 }
 0x338   : > { %868 = vst.msk [vmem:[%s1487_s13] sm:$0xff] %vm232_vm0, %v860_v51  ;;  %v702_v41 = vpop.f32.mrf.mxu2 }
 0x339   : > { %v830_v52 = vmin.f32 %v702_v41, 0.0  ;;  %vm822_vm13 = vcmp.gt.f32.partialorder %v702_v41, 0.0 }
 0x33b   : > { %v840_v53 = vmul.f32 1.442695, %v830_v52 }
 0x33c   : > { %v1117_v54 = vpop.eup %1116 }
 0x33d   : > { %v999_v46 = vadd.f32 -1.0, %v1117_v54  ;;  %1118 = vpow2.f32 %v840_v53 }
 0x33f   : > { %v861_v56 = vsel %vm821_vm12, %v679_v45, %v999_v46  ;;  %v725_v57 = vpop.f32.mrf.mxu3 }
 0x340   : > { %869 = vst.msk [vmem:[%s1487_s13 + $0x8] sm:$0xff] %vm232_vm0, %v861_v56  ;;  %v831_v58 = vmin.f32 %v725_v57, 0.0  ;;  %vm823_vm14 = vcmp.gt.f32.partialorder %v725_v57, 0.0 }
 0x342   : > { %v842_v55 = vmul.f32 1.442695, %v831_v58 }
 0x343   : > { %v1119_v59 = vpop.eup %1118 }
 0x344   : > { %v1000_v60 = vadd.f32 -1.0, %v1119_v59  ;;  %1120 = vpow2.f32 %v842_v55 }
 0x346   : > { %v862_v61 = vsel %vm822_vm13, %v702_v41, %v1000_v60 }
 0x347   : > { %870 = vst.msk [vmem:[%s1487_s13 + $0x10] sm:$0xff] %vm232_vm0, %v862_v61  ;;  %v748_v62 = vpop.f32.mrf.mxu2 }
 0x348   : > { %v832_v63 = vmin.f32 %v748_v62, 0.0  ;;  %vm824_vm15 = vcmp.gt.f32.partialorder %v748_v62, 0.0 }
 0x34a   : > { %v1121_v0 = vpop.eup %1120  ;;  %v844_v1 = vmul.f32 1.442695, %v832_v63 }
 0x34b   : > { %v1001_v2 = vadd.f32 -1.0, %v1121_v0 }
 0x34c   : > { %1122 = vpow2.f32 %v844_v1 }
 0x34d   : > { %v863_v3 = vsel %vm823_vm14, %v725_v57, %v1001_v2 }
 0x34e   : > { %871 = vst.msk [vmem:[%s1487_s13 + $0x18] sm:$0xff] %vm232_vm0, %v863_v3 }
 0x352   : > { %v1123_v4 = vpop.eup %1122  ;;  %v771_v5 = vpop.f32.mrf.mxu3 }
 0x353   : > { %v1002_v6 = vadd.f32 -1.0, %v1123_v4  ;;  %v833_v7 = vmin.f32 %v771_v5, 0.0  ;;  %vm825_vm1 = vcmp.gt.f32.partialorder %v771_v5, 0.0 }
 0x355   : > { %v864_v8 = vsel %vm824_vm15, %v748_v62, %v1002_v6  ;;  %v846_v9 = vmul.f32 1.442695, %v833_v7 }
 0x356   : > { %872 = vst.msk [vmem:[%s1487_s13 + $0x20] sm:$0xff] %vm232_vm0, %v864_v8 }
 0x357   : > { %1124 = vpow2.f32 %v846_v9 }
 0x35a   : > { %v794_v10 = vpop.f32.mrf.mxu2 }
 0x35b   : > { %v834_v11 = vmin.f32 %v794_v10, 0.0  ;;  %vm826_vm2 = vcmp.gt.f32.partialorder %v794_v10, 0.0 }
 0x35d   : > { %v1125_v12 = vpop.eup %1124  ;;  %v848_v13 = vmul.f32 1.442695, %v834_v11 }
 0x35e   : > { %v1003_v14 = vadd.f32 -1.0, %v1125_v12 }
 0x35f   : > { %1126 = vpow2.f32 %v848_v13 }
 0x360   : > { %v865_v15 = vsel %vm825_vm1, %v771_v5, %v1003_v14 }
 0x361   : > { %873 = vst.msk [vmem:[%s1487_s13 + $0x28] sm:$0xff] %vm232_vm0, %v865_v15  ;;  %v817_v16 = vpop.f32.mrf.mxu3 }
 0x362   : > { %v835_v18 = vmin.f32 %v817_v16, 0.0  ;;  %vm827_vm3 = vcmp.gt.f32.partialorder %v817_v16, 0.0 }
 0x364   : > { %v850_v19 = vmul.f32 1.442695, %v835_v18 }
 0x365   : > { %v1127_v20 = vpop.eup %1126 }
 0x366   : > { %v1004_v22 = vadd.f32 -1.0, %v1127_v20  ;;  %1128 = vpow2.f32 %v850_v19 }
 0x368   : > { %v866_v23 = vsel %vm826_vm2, %v794_v10, %v1004_v22 }
 0x369   : > { %874 = vst.msk [vmem:[%s1487_s13 + $0x30] sm:$0xff] %vm232_vm0, %v866_v23 }
 0x36c   : > { %v1129_v26 = vpop.eup %1128 }
 0x36d   : > { %v1005_v27 = vadd.f32 -1.0, %v1129_v26 }
 0x36f   : > { %v867_v28 = vsel %vm827_vm3, %v817_v16, %v1005_v27 }
 0x370   : > { %875 = vst.msk [vmem:[%s1487_s13 + $0x38] sm:$0xff] %vm232_vm0, %v867_v28 }
 0x371   : > { %1187 = shalt.err (!%p1184_p4)
}
 0x372   : > { %s1232_s7 = smov 128   ;;  %s1233_s14 = smov 8  }
 0x373   : > { %1023 = dma.vmem_to_hbm [thread:$0]  (%p1309_p11), %s890_s23, 1024, %s892_s25, %s877_s19, %s1232_s7, %s1232_s7, %s1233_s14  }
 0x374 PF: > { %s906_s12 = sand.u32 1, %s1214_s15   ;;  %p1549_p7 = scmp.ge.s32.totalorder %s1226_s18, 2 }
 0x375   : > { %s907_s13 = scalar_lea.sflag [#allocation4], %s906_s12 }
 0x376   : > { %p1030_p5 = pnand %p1549_p7, %p1313_p12 }
 0x378   : > { %p1031_p8 = pneg %p1030_p5 }
 0x37a   : > { %1209 = dma.done.wait (%p1031_p8), %s907_s13, 1024  }
 0x37b   : > { %1211 = vsyncadd (%p1031_p8), %s907_s13, 4294966272  ;;  %p17_p10 = scmp.ge.s32.totalorder %s1284_s21, 4   ;;  %s1550_s15 = smov %s1218_s16 }
 0x37c   : > { %s1551_s16 = smov %s1222_s17  ;;  %s1552_s17 = smov %s1296_s24 }
 0x37d   : > { %s1553_s18 = smov %s1284_s21  ;;  %19 = sbr.rel (!%p17_p10) target bundleno = 5 (0x5), region = 81 }
 0x382   :  { %913 = vsyncpa [#allocation3], 1 }
 0x383   :  { %915 = vsyncpa [#allocation3 + $0x1], 1 }
 0x384   :  { %916 = vsyncpa [#allocation4], 1 }
 0x385   :  { %918 = vsyncpa [#allocation4 + $0x1], 1 }

</bundles_post_ra>
